<compile_context>
chip_gen: v7x
topology: tpu7x:2x2x1
jax: 0.10.0
libtpu: 0.0.40
codegen_flags: <defaults>
</compile_context>

<pallas_src>
import functools

import jax
import jax.numpy as jnp
from jax.experimental import pallas as pl
from jax.experimental.pallas import tpu as pltpu


def _make_divisible(ch, divisor=8, min_ch=None):
    if min_ch is None:
        min_ch = divisor
    new_ch = max(min_ch, int(ch + divisor / 2) // divisor * divisor)
    if new_ch < 0.9 * ch:
        new_ch += divisor
    return new_ch


def _se_kernel(x_ref, w1t_ref, b1_ref, w2t_ref, b2_ref, o_ref, *, inv_hw):
    # x_ref block: (NB, C, HWp) in the native input dtype.  We never
    # materialize a separate f32 copy of the whole tile: the pool reduces
    # directly and the final multiply happens in the native dtype.
    x = x_ref[...]

    # adaptive_avg_pool2d(x, (1,1)) == sum over (zero-padded) spatial * 1/HW.
    pooled = jnp.sum(x.astype(jnp.float32), axis=-1) * inv_hw          # (NB, C)

    # fc1: 1x1 conv == matmul over channels, + bias, ReLU.
    s1 = jnp.dot(pooled, w1t_ref[...],
                 preferred_element_type=jnp.float32) + b1_ref[...]     # (NB, Cs)
    s1 = jnp.maximum(s1, 0.0)

    # fc2: 1x1 conv == matmul, + bias.
    s2 = jnp.dot(s1, w2t_ref[...],
                 preferred_element_type=jnp.float32) + b2_ref[...]     # (NB, C)

    # hardsigmoid(x) = clamp(x/6 + 0.5, 0, 1); multiply instead of divide.
    scale = jnp.clip(s2 * (1.0 / 6.0) + 0.5, 0.0, 1.0)                 # (NB, C)

    # Broadcast multiply over HW; lane-dense (HWp % 128 == 0) unmasked stores.
    o_ref[...] = (x * scale.astype(o_ref.dtype)[:, :, None]).astype(o_ref.dtype)


def _pick_batch_block(n, bytes_per_sample,
                      target_bytes=2 << 20, vmem_cap=24 << 20):
    """Pick NB samples/step: ~0.5-2 MB x-blocks, stay under the VMEM cap
    (2x double-buffered input + 2x output blocks), >=2 grid steps if possible
    (v7x has 2 TensorCores and only 64 MiB physical VMEM)."""
    nb = max(1, target_bytes // max(1, bytes_per_sample))
    nb = min(nb, max(1, vmem_cap // (4 * max(1, bytes_per_sample))))
    nb = min(nb, n)
    if n > 1 and nb >= n:
        nb = (n + 1) // 2
    return int(nb)


def squeeze_excitation(x, w1, b1, w2, b2):
    """x: (N, C, H, W); w1: (Cs, C); b1: (Cs,); w2: (C, Cs); b2: (C,)."""
    N, C, H, W = x.shape
    Cs = w1.shape[0]
    HW = H * W
    HWp = ((HW + 127) // 128) * 128            # lane-dense output stores

    x_flat = x.reshape(N, C, HW)
    if HWp != HW:
        x_flat = jnp.pad(x_flat, ((0, 0), (0, 0), (0, HWp - HW)))

    # Weights transposed so the batched squeeze path is (NB,C)@(C,Cs) etc.
    w1_t = w1.T                                # (C, Cs)
    w2_t = w2.T                                # (Cs, C)
    # Biases lane-major (1, Cs)/(1, C) instead of (Cs, 1)/(C, 1).
    b1_2d = b1.reshape(1, Cs)
    b2_2d = b2.reshape(1, C)

    itemsize = x.dtype.itemsize
    bytes_per_sample = C * HWp * itemsize
    NB = _pick_batch_block(N, bytes_per_sample)
    grid = (pl.cdiv(N, NB),)

    # Advisory cost: memory-bound read-modify-write of x plus tiny matmuls.
    flops = 4 * N * C * Cs + 3 * N * C * HW
    bytes_accessed = 2 * N * C * HW * itemsize + (2 * C * Cs + C + Cs) * 4

    kernel = functools.partial(_se_kernel, inv_hw=1.0 / HW)

    out = pl.pallas_call(
        kernel,
        out_shape=jax.ShapeDtypeStruct((N, C, HWp), x.dtype),
        grid_spec=pltpu.PrefetchScalarGridSpec(
            num_scalar_prefetch=0,
            grid=grid,
            in_specs=[
                pl.BlockSpec((NB, C, HWp), lambda n: (n, 0, 0)),
                pl.BlockSpec((C, Cs), lambda n: (0, 0)),
                pl.BlockSpec((1, Cs), lambda n: (0, 0)),
                pl.BlockSpec((Cs, C), lambda n: (0, 0)),
                pl.BlockSpec((1, C), lambda n: (0, 0)),
            ],
            out_specs=pl.BlockSpec((NB, C, HWp), lambda n: (n, 0, 0)),
        ),
        compiler_params=pltpu.CompilerParams(
            dimension_semantics=("parallel",),
            vmem_limit_bytes=32 << 20,
        ),
        cost_estimate=pl.CostEstimate(
            flops=flops, transcendentals=0, bytes_accessed=bytes_accessed),
    )(x_flat, w1_t, b1_2d, w2_t, b2_2d)

    if HWp != HW:
        out = out[:, :, :HW]
    return out.reshape(N, C, H, W)


def _reference(x, w1, b1, w2, b2):
    """Pure-JAX reference matching the PyTorch forward."""
    pooled = jnp.mean(x, axis=(2, 3), keepdims=True)                   # (N,C,1,1)
    s = jnp.einsum("sc,ncij->nsij", w1, pooled) + b1[None, :, None, None]
    s = jnp.maximum(s, 0.0)
    s = jnp.einsum("cs,nsij->ncij", w2, s) + b2[None, :, None, None]
    s = jnp.clip(s / 6.0 + 0.5, 0.0, 1.0)
    return x * s


if __name__ == "__main__":
    key = jax.random.PRNGKey(0)

    N, input_c, H, W = 8, 16, 16, 16
    squeeze_c = _make_divisible(input_c // 4, 8)   # -> 8

    kx, k1, k2, k3, k4 = jax.random.split(key, 5)
    x = jax.random.normal(kx, (N, input_c, H, W), dtype=jnp.float32)

    # Conv2d 1x1 weights: (out_c, in_c, 1, 1) -> stored as (out_c, in_c)
    w1 = 0.1 * jax.random.normal(k1, (squeeze_c, input_c), dtype=jnp.float32)
    b1 = 0.1 * jax.random.normal(k2, (squeeze_c,), dtype=jnp.float32)
    w2 = 0.1 * jax.random.normal(k3, (input_c, squeeze_c), dtype=jnp.float32)
    b2 = 0.1 * jax.random.normal(k4, (input_c,), dtype=jnp.float32)

    out = squeeze_excitation(x, w1, b1, w2, b2)
    out = jax.block_until_ready(out)

    ref = _reference(x, w1, b1, w2, b2)
    assert out.shape == ref.shape
    assert jnp.allclose(out, ref, atol=1e-5, rtol=1e-5), "mismatch vs reference"

    print("KERNEL_OK")
</pallas_src>

<mosaic_0001>
module attributes {stable_mosaic.version = 11 : i64} {
  func.func @_se_kernel(%arg0: i32, %arg1: memref<4x16x256xf32, #tpu.memory_space<vmem>>, %arg2: memref<16x8xf32, #tpu.memory_space<vmem>>, %arg3: memref<1x8xf32, #tpu.memory_space<vmem>>, %arg4: memref<8x16xf32, #tpu.memory_space<vmem>>, %arg5: memref<1x16xf32, #tpu.memory_space<vmem>>, %arg6: memref<4x16x256xf32, #tpu.memory_space<vmem>>) attributes {dimension_semantics = [#tpu.dimension_semantics<parallel>], iteration_bounds = array<i64: 2>, scalar_prefetch = 0 : i64, scratch_operands = 0 : i64, tpu.core_type = #tpu.core_type<tc>, window_params = [{transform_indices = @transform_0, window_bounds = array<i64: 4, 16, 256>}, {pipeline_mode = #tpu.pipeline_mode<synchronous>, transform_indices = @transform_1, window_bounds = array<i64: 16, 8>}, {pipeline_mode = #tpu.pipeline_mode<synchronous>, transform_indices = @transform_2, window_bounds = array<i64: 1, 8>}, {pipeline_mode = #tpu.pipeline_mode<synchronous>, transform_indices = @transform_3, window_bounds = array<i64: 8, 16>}, {pipeline_mode = #tpu.pipeline_mode<synchronous>, transform_indices = @transform_4, window_bounds = array<i64: 1, 16>}, {transform_indices = @transform_5, window_bounds = array<i64: 4, 16, 256>}]} {
    %c0 = arith.constant 0 : index
    %c0_0 = arith.constant 0 : index
    %c0_1 = arith.constant 0 : index
    %0 = vector.load %arg1[%c0, %c0_0, %c0_1] : memref<4x16x256xf32, #tpu.memory_space<vmem>>, vector<4x16x256xf32>
    %cst = arith.constant dense<0.000000e+00> : vector<4x16xf32>
    %1 = vector.multi_reduction <add>, %0, %cst [2] : vector<4x16x256xf32> to vector<4x16xf32>
    %cst_2 = arith.constant 3.906250e-03 : f32
    %2 = vector.broadcast %cst_2 : f32 to vector<4x16xf32>
    %3 = arith.mulf %1, %2 : vector<4x16xf32>
    %c0_3 = arith.constant 0 : index
    %c0_4 = arith.constant 0 : index
    %4 = vector.load %arg2[%c0_3, %c0_4] : memref<16x8xf32, #tpu.memory_space<vmem>>, vector<16x8xf32>
    %cst_5 = arith.constant dense<0.000000e+00> : vector<4x8xf32>
    %5 = tpu.matmul %3, %4, %cst_5 {dimension_numbers = #tpu.dot_dimension_numbers<[1], [0], [0], [1], [0, 0, 1, 1], [], []>} : vector<4x16xf32>, vector<16x8xf32>, vector<4x8xf32> -> vector<4x8xf32>
    %c0_6 = arith.constant 0 : index
    %c0_7 = arith.constant 0 : index
    %6 = vector.load %arg3[%c0_6, %c0_7] : memref<1x8xf32, #tpu.memory_space<vmem>>, vector<1x8xf32>
    %7 = vector.broadcast %6 : vector<1x8xf32> to vector<4x8xf32>
    %8 = arith.addf %5, %7 : vector<4x8xf32>
    %cst_8 = arith.constant 0.000000e+00 : f32
    %9 = vector.broadcast %cst_8 : f32 to vector<4x8xf32>
    %10 = arith.maximumf %8, %9 : vector<4x8xf32>
    %c0_9 = arith.constant 0 : index
    %c0_10 = arith.constant 0 : index
    %11 = vector.load %arg4[%c0_9, %c0_10] : memref<8x16xf32, #tpu.memory_space<vmem>>, vector<8x16xf32>
    %cst_11 = arith.constant dense<0.000000e+00> : vector<4x16xf32>
    %12 = tpu.matmul %10, %11, %cst_11 {dimension_numbers = #tpu.dot_dimension_numbers<[1], [0], [0], [1], [0, 0, 1, 1], [], []>} : vector<4x8xf32>, vector<8x16xf32>, vector<4x16xf32> -> vector<4x16xf32>
    %c0_12 = arith.constant 0 : index
    %c0_13 = arith.constant 0 : index
    %13 = vector.load %arg5[%c0_12, %c0_13] : memref<1x16xf32, #tpu.memory_space<vmem>>, vector<1x16xf32>
    %14 = vector.broadcast %13 : vector<1x16xf32> to vector<4x16xf32>
    %15 = arith.addf %12, %14 : vector<4x16xf32>
    %cst_14 = arith.constant 0.166666672 : f32
    %16 = vector.broadcast %cst_14 : f32 to vector<4x16xf32>
    %17 = arith.mulf %15, %16 : vector<4x16xf32>
    %cst_15 = arith.constant 5.000000e-01 : f32
    %18 = vector.broadcast %cst_15 : f32 to vector<4x16xf32>
    %19 = arith.addf %17, %18 : vector<4x16xf32>
    %cst_16 = arith.constant 0.000000e+00 : f32
    %cst_17 = arith.constant 1.000000e+00 : f32
    %20 = vector.broadcast %cst_16 : f32 to vector<4x16xf32>
    %21 = arith.maximumf %20, %19 : vector<4x16xf32>
    %22 = vector.broadcast %cst_17 : f32 to vector<4x16xf32>
    %23 = arith.minimumf %22, %21 : vector<4x16xf32>
    %24 = vector.shape_cast %23 : vector<4x16xf32> to vector<4x16x1xf32>
    %25 = vector.broadcast %24 : vector<4x16x1xf32> to vector<4x16x256xf32>
    %26 = arith.mulf %0, %25 : vector<4x16x256xf32>
    %c0_18 = arith.constant 0 : index
    %c0_19 = arith.constant 0 : index
    %c0_20 = arith.constant 0 : index
    %27 = vector.load %arg6[%c0_18, %c0_19, %c0_20] : memref<4x16x256xf32, #tpu.memory_space<vmem>>, vector<4x16x256xf32>
    tpu.vector_store %arg6[%c0_18, %c0_19, %c0_20], %26 {strides = array<i32>} : memref<4x16x256xf32, #tpu.memory_space<vmem>>, vector<4x16x256xf32>,
    return
  }
  func.func @transform_0(%arg0: i32) -> (i32, i32, i32) {
    %c0_i32 = arith.constant 0 : i32
    %c0_i32_0 = arith.constant 0 : i32
    %c0_i32_1 = arith.constant 0 : i32
    return %arg0, %c0_i32, %c0_i32_0 : i32, i32, i32
  }
  func.func @transform_1(%arg0: i32) -> (i32, i32) {
    %c0_i32 = arith.constant 0 : i32
    %c0_i32_0 = arith.constant 0 : i32
    %c0_i32_1 = arith.constant 0 : i32
    return %c0_i32, %c0_i32_0 : i32, i32
  }
  func.func @transform_2(%arg0: i32) -> (i32, i32) {
    %c0_i32 = arith.constant 0 : i32
    %c0_i32_0 = arith.constant 0 : i32
    %c0_i32_1 = arith.constant 0 : i32
    return %c0_i32, %c0_i32_0 : i32, i32
  }
  func.func @transform_3(%arg0: i32) -> (i32, i32) {
    %c0_i32 = arith.constant 0 : i32
    %c0_i32_0 = arith.constant 0 : i32
    %c0_i32_1 = arith.constant 0 : i32
    return %c0_i32, %c0_i32_0 : i32, i32
  }
  func.func @transform_4(%arg0: i32) -> (i32, i32) {
    %c0_i32 = arith.constant 0 : i32
    %c0_i32_0 = arith.constant 0 : i32
    %c0_i32_1 = arith.constant 0 : i32
    return %c0_i32, %c0_i32_0 : i32, i32
  }
  func.func @transform_5(%arg0: i32) -> (i32, i32, i32) {
    %c0_i32 = arith.constant 0 : i32
    %c0_i32_0 = arith.constant 0 : i32
    %c0_i32_1 = arith.constant 0 : i32
    return %arg0, %c0_i32, %c0_i32_0 : i32, i32, i32
  }
}

</mosaic_0001>

<bundles_post_ra>
// kernel: tpu_custom_call.1
= control target key start
LH: loop header
LB: loop body
LE: loop exit
PB: predicated region body
PF: predicated region fallthrough
CT: control target
= control target key end

     0   :  { %10 = vsyncpa [#allocation3], 0  ;;  %s1191_s0 = inlined_call_operand.hbm [shape: f32[8,16,256], index: 0, kind: input, shape index: {}]   ;;  %s1192_s1 = inlined_call_operand.vmem [shape: f32[16,8], index: 1, kind: input, shape index: {}]   ;;  %s1193_s2 = inlined_call_operand.vmem [shape: f32[1,8], index: 2, kind: input, shape index: {}]   ;;  %s1194_s3 = inlined_call_operand.vmem [shape: f32[8,16], index: 3, kind: input, shape index: {}]   ;;  %s1195_s4 = inlined_call_operand.vmem [shape: f32[1,16], index: 4, kind: input, shape index: {}]   ;;  %s1196_s5 = inlined_call_operand.hbm [shape: f32[8,16,256], index: 5, kind: output, shape index: {}]  }
   0x1   :  { %12 = vsyncpa [#allocation3 + $0x1], 0 }
   0x2   :  { %13 = vsyncpa [#allocation4], 0 }
   0x3   :  { %15 = vsyncpa [#allocation4 + $0x1], 0  ;;  %s915_s18 = smov 0   ;;  %s917_s19 = smov 0  }
   0x4   :  { %s919_s20 = smov 0   ;;  %s921_s21 = smov 0  }
   0x5 LB: > { %s936_s22 = sadd.s32 4294967295, %s874_s21   ;;  %s681_s23 = sadd.s32 4294967294, %s874_s21   ;;  %s874_s21 = sphi %s921_s21, %s1209_s21   ;;  %s870_s20 = sphi %s919_s20, %s1208_s20   ;;  %s866_s19 = sphi %s917_s19, %s1207_s19   ;;  %s862_s18 = sphi %s915_s18, %s1206_s18  }
   0x6   : > { %s940_s24 = sadd.s32 1, %s874_s21   ;;  %s28_s25 = sadd.s32 1, %s870_s20 }
   0x7   : > { %s25_s26 = ssub.s32 %s874_s21, %s940_s24  ;;  %p35_p0 = scmp.ne.s32.totalorder %s870_s20, %s866_s19 }
   0x8   : > { %p26_p1 = scmp.eq.s32.totalorder %s25_s26, 0  ;;  %p36_p2 = scmp.eq.s32.totalorder %s874_s21, 0 }
   0x9   : > { %p41_p3 = scmp.ne.s32.totalorder %s866_s19, %s862_s18  ;;  %p42_p4 = scmp.eq.s32.totalorder %s936_s22, 0 }
   0xa   : > { %s952_s27 = scalar_select %p26_p1, %s870_s20, %s28_s25  }
   0xb   : > { %p954_p5 = por %p36_p2, %p35_p0  ;;  %p958_p6 = por %p42_p4, %p41_p3 }
   0xc   : > { %p149_p7 = scmp.eq.s32.totalorder %s936_s22, 1  ;;  %p155_p8 = scmp.eq.s32.totalorder %s681_s23, 1 }
   0xd   : > { %p737_p10 = scmp.lt.s32.totalorder %s874_s21, 2  ;;  %s187_s7 = sand.u32 1, %s870_s20  }
   0xe   : > { %p965_p11 = por %p149_p7, %p35_p0  ;;  %p969_p12 = por %p155_p8, %p41_p3 }
   0xf   : > { %s702_s8 = sshll.u32 %s874_s21, 11  ;;  %s684_s9 = sshll.u32 %s187_s7, 7 }
  0x10   : > { %s1200_s30 = scalar_select %p965_p11, 1, 0 }
  0x11   : > { %s1201_s6 = scalar_select %p969_p12, 1, 0 }
  0x12   : > { %s978_s12 = scalar_lea.hbm %s1191_s0, %s702_s8  ;;  %s191_s13 = scalar_lea.vmem [#allocation2], %s684_s9 }
  0x13   : > { %s199_s14 = sshll.u32 %s191_s13, 4  ;;  %p982_p13 = pnand %p737_p10, %p954_p5  ;;  %s986_s14 = int_to_ptr.vmem [resolvable:$true] %s199_s14 }
  0x14   : > { %s988_s16 = scalar_lea.sflag [#allocation3], %s187_s7  ;;  %s778_s17 = scalar_lea.hbm %s978_s12, 2048 }
  0x15   : > { %p779_p0 = scmp.ne.s32.totalorder %s978_s12, %s778_s17  ;;  %p780_p1 = pneg %p982_p13 }
  0x16   : > { %s783_s26 = scalar_lea.hbm %s1191_s0, 4096  ;;  %p784_p4 = scmp.lt.u32.totalorder %s978_s12, %s1191_s0 }
  0x17   : > { %p781_p2 = pnand %p780_p1, %p779_p0  ;;  %p785_p5 = scmp.lt.u32.totalorder %s783_s26, %s778_s17 }
  0x18   : > { %p787_p8 = scmp.lt.u32.totalorder %s778_s17, %s978_s12 }
  0x19   : > { %p782_p3 = pneg %p781_p2  ;;  %p786_p7 = por %p785_p5, %p784_p4 }
  0x1b   : > { %p788_p10 = por %p787_p8, %p786_p7 }
  0x1d   : > { %p789_p9 = pnand %p788_p10, %p782_p3 }
  0x1f   : > { %792 = shalt.err (!%p789_p9)
}
  0x20   : > { %s793_s7 = scalar_lea.vmem %s986_s14, 2048  ;;  %s876_s9 = smov [#allocation2]  }
  0x21   : > { %p794_p0 = scmp.ne.s32.totalorder %s986_s14, %s793_s7  ;;  %s798_s10 = sshll.u32 %s876_s9, 4  ;;  %s799_s10 = int_to_ptr.vmem [resolvable:$false] %s798_s10 }
  0x22   : > { %s800_s11 = scalar_lea.vmem %s799_s10, 4096  ;;  %p801_p11 = scmp.lt.s32.totalorder %s986_s14, %s799_s10 }
  0x23   : > { %p796_p2 = pnand %p794_p0, %p780_p1  ;;  %p802_p4 = scmp.lt.s32.totalorder %s800_s11, %s793_s7 }
  0x25   : > { %p797_p12 = pneg %p796_p2  ;;  %p803_p5 = por %p802_p4, %p801_p11 }
  0x27   : > { %p804_p7 = pnand %p803_p5, %p797_p12 }
  0x29   : > { %807 = shalt.err (!%p804_p7)
}
  0x2a   : > { %s877_s13 = smov 256   ;;  %s878_s17 = smov 16  }
  0x2b   : > { %732 = dma.hbm_to_vmem [thread:$0]  (!%p982_p13), %s978_s12, 2048, %s986_s14, %s988_s16, %s877_s13, %s877_s13, %s878_s17  }
  0x2c   : > { %p688_p9 = scmp.ge.s32.totalorder %s874_s21, 1  ;;  %p207_p1 = scmp.lt.s32.totalorder %s874_s21, 3 }
  0x2e   : > { %p208_p3 = pnand %p688_p9, %p207_p1 }
  0x2f   : > { %s1019_s23 = sand.u32 (!%p208_p3), 1, %s866_s19  }
  0x30   : > { %211 = sbr.rel (%p208_p3) target bundleno = 808 (0x328), region = 40  ;;  %s689_s25 = sshll.u32 (!%p208_p3), %s1019_s23, 7 }
  0x31   : > { %s214_s26 = scalar_lea.sflag (!%p208_p3), [#allocation3], %s1019_s23  ;;  %s217_s28 = scalar_lea.vmem (!%p208_p3), [#allocation2], %s689_s25 }
  0x37   : > { %853 = dma.done.wait (%p958_p6), %s214_s26, 2048  }
  0x38   : > { %855 = vsyncadd (%p958_p6), %s214_s26, 4294965248  ;;  %v1029_v0 = vld [vmem:[%s217_s28 + $0x20] sm:$0xff]  ;;  %v1031_v1 = vld [vmem:[%s217_s28 + $0x28] sm:$0xff]  ;;  %v879_v27 = vmov 0.0|0.0   ;;  %vm880_vm0 = vmmov 0   ;;  %v881_v28 = vmov 0.0   ;;  %v311_v29 = vlaneseq }
  0x39   : > { %v1033_v2 = vld [vmem:[%s217_s28] sm:$0xff]  ;;  %v268_v3 = vadd.f32 %v1031_v1, %v1029_v0  ;;  %v1037_v4 = vld [vmem:[%s217_s28 + $0x8] sm:$0xff]  ;;  %v1039_v5 = vld [vmem:[%s217_s28 + $0x30] sm:$0xff]  ;;  %722 = vmatprep.subr.bf16.mxu0 %v879_v27  ;;  %714 = vmatprep.mubr.msk.f32.mxu0 %vm880_vm0, %v881_v28  ;;  %vm322_vm1 = vcmask 130112   ;;  %vm351_vm2 = vcmask 1041409   ;;  %vm353_vm3 = vcmask 1042434  }
  0x3a   : > { %v1041_v6 = vld [vmem:[%s217_s28 + $0x38] sm:$0xff]  ;;  %v262_v7 = vadd.f32 %v1037_v4, %v1033_v2  ;;  %v1045_v8 = vld [vmem:[%s217_s28 + $0x10] sm:$0xff]  ;;  %v1057_v14 = vld [vmem:[%s217_s28 + $0x40] sm:$0xff]  ;;  %717 = vmatprep.subr.mxu1 %v881_v28  ;;  %719 = vmatprep.mubr.msk.f32.mxu1 %vm880_vm0, %v881_v28  ;;  %v312_v30 = vand.u32 127, %v311_v29  ;;  %v1083_v34 = vshrl.u32 %v311_v29, 7  ;;  %vm355_vm4 = vcmask 1043459  }
  0x3b   : > { %v1047_v9 = vld [vmem:[%s217_s28 + $0x18] sm:$0xff]  ;;  %269 = vadd.xlane.f32.xlu1 %v268_v3  ;;  %v271_v10 = vadd.f32 %v1041_v6, %v1039_v5  ;;  %v1053_v12 = vld [vmem:[%s217_s28 + $0x50] sm:$0xff]  ;;  %v1059_v15 = vld [vmem:[%s217_s28 + $0x48] sm:$0xff]  ;;  %vm357_vm5 = vcmask 130048   ;;  %vm439_vm6 = vcmask 64512   ;;  %s1110_s13 = scalar_lea.vmem [#allocation5], %s689_s25 }
  0x3c   : > { %263 = vadd.xlane.f32.xlu0 %v262_v7  ;;  %v265_v11 = vadd.f32 %v1047_v9, %v1045_v8  ;;  %v1055_v13 = vld [vmem:[%s217_s28 + $0x58] sm:$0xff]  ;;  %v274_v17 = vadd.f32 %v1059_v15, %v1057_v14  ;;  %v1065_v18 = vld [vmem:[%s217_s28 + $0x70] sm:$0xff]  ;;  %v1069_v20 = vld [vmem:[%s217_s28 + $0x60] sm:$0xff]  ;;  %v317_v33 = vadd.s32 4294967288, %v312_v30  ;;  %v315_v40 = vsub.s32 %v312_v30, %v1083_v34  ;;  %s704_s17 = sshll.u32 %s936_s22, 11  ;;  %s608_s25 = sshll.u32 %s1110_s13, 4  ;;  %s1143_s25 = int_to_ptr.vmem [resolvable:$true] %s608_s25 }
  0x3d   : > { %v277_v16 = vadd.f32 %v1055_v13, %v1053_v12  ;;  %v1067_v19 = vld [vmem:[%s217_s28 + $0x78] sm:$0xff]  ;;  %v1071_v21 = vld [vmem:[%s217_s28 + $0x68] sm:$0xff]  ;;  %v294_v24 = vld [vmem:[%s1192_s1] sm:$0xff]  ;;  %s1141_s29 = scalar_lea.hbm %s1196_s5, %s704_s17  ;;  %s594_s22 = scalar_lea.sflag [#allocation4], %s1019_s23 }
  0x3e   : > { %v283_v22 = vadd.f32 %v1067_v19, %v1065_v18  ;;  %v280_v23 = vadd.f32 %v1071_v21, %v1069_v20  ;;  %v295_v25 = vld [vmem:[%s1192_s1 + $0x8] sm:$0xff]  ;;  %v320_v37 = vsub.s32 %v317_v33, %v1083_v34  ;;  %s808_s12 = scalar_lea.vmem %s1143_s25, 2048  ;;  %p1203_p11 = scmp.ne.s32.totalorder %s1200_s30, 0 }
  0x3f   : > { %272 = vadd.xlane.f32.xlu1 %v271_v10  ;;  %v723_v26 = vpack.c.bf16 %v295_v25, %v294_v24  ;;  %v431_v10 = vld [vmem:[%s1194_s3] sm:$0xff]  ;;  %p809_p6 = scmp.ne.s32.totalorder %s1143_s25, %s808_s12  ;;  %s882_s14 = smov [#allocation5]  }
  0x40   : > { %266 = vadd.xlane.f32.xlu0 %v265_v11  ;;  %718 = vmatpush3.msra.mxu1 %v431_v10  ;;  %v691_v11 = vld [vmem:[%s1193_s2] ss:$0 sm:$0xff]  ;;  %s812_s15 = sshll.u32 %s882_s14, 4  ;;  %s813_s15 = int_to_ptr.vmem [resolvable:$false] %s812_s15 }
  0x41   : > { %724 = vmatpush3.bf16.msra.mxu0 %v723_v26  ;;  %v693_v24 = vld [vmem:[%s1195_s4] ss:$0 sm:$0xff]  ;;  %p810_p12 = pnand %p809_p6, %p1203_p11  ;;  %s814_s16 = scalar_lea.vmem %s813_s15, 4096 }
  0x42   : > { %p815_p8 = scmp.lt.s32.totalorder %s1143_s25, %s813_s15  ;;  %p816_p10 = scmp.lt.s32.totalorder %s814_s16, %s808_s12 }
  0x43   : > { %278 = vadd.xlane.f32.xlu1 %v277_v16  ;;  %p811_p13 = pneg %p810_p12 }
  0x44   : > { %275 = vadd.xlane.f32.xlu0 %v274_v17  ;;  %p817_p0 = por %p816_p10, %p815_p8 }
  0x46   : > { %p818_p2 = pnand %p817_p0, %p811_p13 }
  0x47   : > { %284 = vadd.xlane.f32.xlu1 %v283_v22 }
  0x48   : > { %281 = vadd.xlane.f32.xlu0 %v280_v23 }
  0xc8   : > { %v270_v31 = vpop.xlane.xlu1 %269 }
  0xc9   : > { %v264_v32 = vpop.xlane.xlu0 %263  ;;  %v288_v41 = vmul.f32 0.00390625, %v270_v31  ;;  %v519_v31 = vsub.s32 0, %v1083_v34 }
  0xca   : > { %v286_v42 = vmul.f32 0.00390625, %v264_v32 }
  0xcb   : > { %v327_v50 = vrot.slane %v288_v41, %v315_v40 }
  0xcc   : > { %v273_v35 = vpop.xlane.xlu1 %272  ;;  %v316_v51 = vrot.slane %v286_v42, %v315_v40 }
  0xcd   : > { %v267_v36 = vpop.xlane.xlu0 %266  ;;  %v289_v38 = vmul.f32 0.00390625, %v273_v35  ;;  %v530_v35 = vsub.s32 1, %v1083_v34 }
  0xce   : > { %v287_v39 = vmul.f32 0.00390625, %v267_v36  ;;  %v541_v36 = vsub.s32 2, %v1083_v34 }
  0xcf   : > { %v331_v46 = vrot.slane %v289_v38, %v320_v37 }
  0xd0   : > { %v279_v43 = vpop.xlane.xlu1 %278  ;;  %v321_v47 = vrot.slane %v287_v39, %v320_v37  ;;  %v552_v39 = vsub.s32 3, %v1083_v34 }
  0xd1   : > { %v291_v44 = vmul.f32 0.00390625, %v279_v43  ;;  %v276_v45 = vpop.xlane.xlu0 %275  ;;  %v332_v56 = vsel %vm322_vm1, %v331_v46, %v327_v50 }
  0xd2   : > { %v290_v48 = vmul.f32 0.00390625, %v276_v45  ;;  %v323_v57 = vsel %vm322_vm1, %v321_v47, %v316_v51 }
  0xd3   : > { %v340_v49 = vrot.slane %v291_v44, %v320_v37  ;;  %v352_v62 = vsel %vm351_vm2, %v332_v56, %v323_v57 }
  0xd4   : > { %v336_v52 = vrot.slane %v290_v48, %v315_v40  ;;  %v285_v53 = vpop.xlane.xlu1 %284 }
  0xd5   : > { %v293_v54 = vmul.f32 0.00390625, %v285_v53  ;;  %v282_v55 = vpop.xlane.xlu0 %281 }
  0xd6   : > { %v292_v58 = vmul.f32 0.00390625, %v282_v55  ;;  %v341_v59 = vsel %vm322_vm1, %v340_v49, %v336_v52 }
  0xd7   : > { %v349_v60 = vrot.slane %v293_v54, %v320_v37  ;;  %v354_v3 = vsel %vm353_vm3, %v341_v59, %v352_v62 }
  0xd8   : > { %v345_v61 = vrot.slane %v292_v58, %v315_v40 }
  0xda   : > { %v350_v63 = vsel %vm322_vm1, %v349_v60, %v345_v61 }
  0xdb   : > { %v356_v7 = vsel %vm355_vm4, %v350_v63, %v354_v3 }
  0xdc   : > { %715 = vmatmul.mubr.msk.f32.vlgmr.msra.gmra.mrb[0].mxu0 %vm357_vm5, %v356_v7 }
 0x1af   : > { %v426_v16 = vpop.f32.mrb[0].mxu0 }
 0x1b0   : > { %v427_v17 = vadd.f32 %v691_v11, %v426_v16  ;;  %v716_v22 = vpop.f32.mrb[1].mxu0 }
 0x1b2   : > { %v430_v23 = vmax.f32 %v427_v17, 0.0 }
 0x1b4   : > { %720 = vmatmul.mubr.msk.f32.vlgmr.msra.gmra.mrb[0].mxu1 %vm439_vm6, %v430_v23 }
 0x287   : > { %v509_v25 = vpop.f32.mrb[0].mxu1 }
 0x288   : > { %v510_v26 = vadd.f32 %v693_v24, %v509_v25  ;;  %v721_v27 = vpop.f32.mrb[1].mxu1 }
 0x28a   : > { %v513_v28 = vmul.f32 0.16666667, %v510_v26 }
 0x28c   : > { %v514_v29 = vadd.f32 0.5, %v513_v28 }
 0x28e   : > { %v515_v30 = vmax.f32 %v514_v29, 0.0 }
 0x290   : > { %v516_v32 = vmin.f32 %v515_v30, 1.0 }
 0x292   : > { %v520_v33 = vrot.slane %v516_v32, %v519_v31  ;;  %v531_v37 = vrot.slane %v516_v32, %v530_v35  ;;  %v542_v38 = vrot.slane %v516_v32, %v541_v36  ;;  %v553_v40 = vrot.slane %v516_v32, %v552_v39 }
 0x294   : > { %526 = vbcast.lane.b32.xlu1 %v520_v33, 264  ;;  %522 = vbcast.lane.b32.xlu0 %v520_v33, 256 }
 0x298   : > { %533 = vbcast.lane.b32.xlu1 %v531_v37, 256  ;;  %544 = vbcast.lane.b32.xlu0 %v542_v38, 256 }
 0x29c   : > { %537 = vbcast.lane.b32.xlu1 %v531_v37, 264  ;;  %555 = vbcast.lane.b32.xlu0 %v553_v40, 256 }
 0x2a0   : > { %548 = vbcast.lane.b32.xlu1 %v542_v38, 264 }
 0x2a4   : > { %559 = vbcast.lane.b32.xlu1 %v553_v40, 264 }
 0x306   : > { %v527_v41 = vpop.permute.xlu1 %526  ;;  %v523_v42 = vpop.permute.xlu0 %522 }
 0x307   : > { %v563_v43 = vmul.f32 %v527_v41, %v1045_v8  ;;  %v564_v44 = vmul.f32 %v527_v41, %v1047_v9  ;;  %v561_v45 = vmul.f32 %v523_v42, %v1033_v2  ;;  %v562_v46 = vmul.f32 %v523_v42, %v1037_v4 }
 0x309   : > { %579 = vst [vmem:[%s1110_s13 + $0x10] sm:$0xff] %v563_v43  ;;  %580 = vst [vmem:[%s1110_s13 + $0x18] sm:$0xff] %v564_v44 }
 0x30a   : > { %577 = vst [vmem:[%s1110_s13] sm:$0xff] %v561_v45  ;;  %578 = vst [vmem:[%s1110_s13 + $0x8] sm:$0xff] %v562_v46  ;;  %v534_v8 = vpop.permute.xlu1 %533  ;;  %v545_v2 = vpop.permute.xlu0 %544 }
 0x30b   : > { %v565_v4 = vmul.f32 %v534_v8, %v1029_v0  ;;  %v566_v9 = vmul.f32 %v534_v8, %v1031_v1  ;;  %v569_v34 = vmul.f32 %v545_v2, %v1057_v14  ;;  %v570_v47 = vmul.f32 %v545_v2, %v1059_v15 }
 0x30d   : > { %581 = vst [vmem:[%s1110_s13 + $0x20] sm:$0xff] %v565_v4  ;;  %582 = vst [vmem:[%s1110_s13 + $0x28] sm:$0xff] %v566_v9 }
 0x30e   : > { %585 = vst [vmem:[%s1110_s13 + $0x40] sm:$0xff] %v569_v34  ;;  %586 = vst [vmem:[%s1110_s13 + $0x48] sm:$0xff] %v570_v47  ;;  %v538_v48 = vpop.permute.xlu1 %537  ;;  %v556_v49 = vpop.permute.xlu0 %555 }
 0x30f   : > { %v567_v0 = vmul.f32 %v538_v48, %v1039_v5  ;;  %v568_v50 = vmul.f32 %v538_v48, %v1041_v6  ;;  %v573_v1 = vmul.f32 %v556_v49, %v1069_v20  ;;  %v574_v14 = vmul.f32 %v556_v49, %v1071_v21 }
 0x311   : > { %583 = vst [vmem:[%s1110_s13 + $0x30] sm:$0xff] %v567_v0  ;;  %584 = vst [vmem:[%s1110_s13 + $0x38] sm:$0xff] %v568_v50 }
 0x312   : > { %589 = vst [vmem:[%s1110_s13 + $0x60] sm:$0xff] %v573_v1  ;;  %590 = vst [vmem:[%s1110_s13 + $0x68] sm:$0xff] %v574_v14  ;;  %v549_v15 = vpop.permute.xlu1 %548 }
 0x313   : > { %v571_v51 = vmul.f32 %v549_v15, %v1053_v12  ;;  %v572_v52 = vmul.f32 %v549_v15, %v1055_v13 }
 0x315   : > { %587 = vst [vmem:[%s1110_s13 + $0x50] sm:$0xff] %v571_v51  ;;  %588 = vst [vmem:[%s1110_s13 + $0x58] sm:$0xff] %v572_v52 }
 0x316   : > { %v560_v5 = vpop.permute.xlu1 %559 }
 0x317   : > { %v575_v6 = vmul.f32 %v560_v5, %v1065_v18  ;;  %v576_v12 = vmul.f32 %v560_v5, %v1067_v19 }
 0x319   : > { %591 = vst [vmem:[%s1110_s13 + $0x70] sm:$0xff] %v575_v6  ;;  %592 = vst [vmem:[%s1110_s13 + $0x78] sm:$0xff] %v576_v12 }
 0x31a   : > { %821 = shalt.err (!%p818_p2)
}
 0x31b   : > { %s822_s8 = scalar_lea.hbm %s1141_s29, 2048  ;;  %s826_s10 = scalar_lea.hbm %s1196_s5, 4096 }
 0x31c   : > { %p823_p4 = scmp.ne.s32.totalorder %s1141_s29, %s822_s8  ;;  %p827_p9 = scmp.lt.u32.totalorder %s1141_s29, %s1196_s5 }
 0x31d   : > { %p828_p1 = scmp.lt.u32.totalorder %s826_s10, %s822_s8  ;;  %p830_p6 = scmp.lt.u32.totalorder %s822_s8, %s1141_s29 }
 0x31e   : > { %p824_p5 = pnand %p823_p4, %p1203_p11 }
 0x31f   : > { %p829_p3 = por %p828_p1, %p827_p9 }
 0x320   : > { %p825_p7 = pneg %p824_p5 }
 0x321   : > { %p831_p12 = por %p830_p6, %p829_p3 }
 0x323   : > { %p832_p13 = pnand %p831_p12, %p825_p7 }
 0x325   : > { %835 = shalt.err (!%p832_p13)
}
 0x326   : > { %s883_s17 = smov 256   ;;  %s884_s26 = smov 16  }
 0x327   : > { %727 = dma.vmem_to_hbm [thread:$0]  (%p1203_p11), %s1143_s25, 2048, %s1141_s29, %s594_s22, %s883_s17, %s883_s17, %s884_s26  }
 0x328 PF: > { %s623_s28 = sand.u32 1, %s862_s18   ;;  %p1204_p8 = scmp.ne.s32.totalorder %s1201_s6, 0 }
 0x329   : > { %p1205_p10 = scmp.ge.s32.totalorder %s874_s21, 2  ;;  %s624_s12 = scalar_lea.sflag [#allocation4], %s623_s28 }
 0x32b   : > { %p734_p0 = pnand %p1205_p10, %p1204_p8 }
 0x32d   : > { %857 = dma.done.wait (!%p734_p0), %s624_s12, 2048  }
 0x32e   : > { %859 = vsyncadd (!%p734_p0), %s624_s12, 4294965248  ;;  %p18_p2 = scmp.ge.s32.totalorder %s940_s24, 4   ;;  %s1206_s18 = smov %s866_s19 }
 0x32f   : > { %s1207_s19 = smov %s870_s20  ;;  %s1208_s20 = smov %s952_s27 }
 0x330   : > { %s1209_s21 = smov %s940_s24  ;;  %20 = sbr.rel (!%p18_p2) target bundleno = 5 (0x5), region = 85 }
 0x337   :  { %629 = vsyncpa [#allocation3], 1 }
 0x338   :  { %631 = vsyncpa [#allocation3 + $0x1], 1 }
 0x339   :  { %632 = vsyncpa [#allocation4], 1 }
 0x33a   :  { %634 = vsyncpa [#allocation4 + $0x1], 1 }

</bundles_post_ra>
